<compile_context>
chip_gen: v7x
topology: tpu7x:2x2x1
jax: 0.10.0
libtpu: 0.0.40
codegen_flags: <defaults>
</compile_context>

<pallas_src>
import functools

import jax
import jax.numpy as jnp
from jax.experimental import pallas as pl
from jax.experimental.pallas import tpu as pltpu

_LANE = 128
_MAX_NB = 512      # lanes per block -> 8*512 = 4096 cells per grid step
_MIN_BLOCKS = 8    # target grid depth: pipelining + v7x two-TC sharding


def _round_up(x, m):
    return -(-x // m) * m


def _yolo_block_kernel(pred_ref, targ_ref, out_ref, *, S, l_coord, l_noobj):
    """One grid step: 8*nb cells, channel-major dense (8, nb) tiles."""
    f32 = jnp.float32

    def P(k):
        return pred_ref[0, k].astype(f32)      # (8, nb) dense tile

    def T(k):
        return targ_ref[0, k].astype(f32)

    t_conf = T(4)
    has_obj = t_conf > 0.0                     # contains_object_mask
    zero = jnp.zeros_like(t_conf)

    # ---- get_no_object_loss: confidences (channels 4, 9) of no-object cells.
    d4 = P(4) - t_conf
    d9 = P(9) - T(9)
    noobj_cell = jnp.where(t_conf == 0.0, d4 * d4 + d9 * d9, zero)

    # ---- get_class_prediction_loss: channels 10..29 of object cells.
    cls = zero
    for k in range(10, 30):                    # unrolled; short dep chain
        dk = P(k) - T(k)
        cls = cls + dk * dk
    class_cell = jnp.where(has_obj, cls, zero)

    # ---- find_best_iou_boxes (vectorized): both predicted boxes of a cell
    #      are matched against the cell's FIRST target box.
    tx, ty, tw, th = T(0), T(1), T(2), T(3)
    tx1 = tx / S - 0.5 * tw
    ty1 = ty / S - 0.5 * th
    tx2 = tx / S + 0.5 * tw
    ty2 = ty / S + 0.5 * th
    t_area = (tx2 - tx1) * (ty2 - ty1)         # hoisted: shared by both IOUs

    def iou_with_target(px, py, pw, ph):
        x1 = px / S - 0.5 * pw
        y1 = py / S - 0.5 * ph
        x2 = px / S + 0.5 * pw
        y2 = py / S + 0.5 * ph
        iw = jnp.maximum(jnp.minimum(x2, tx2) - jnp.maximum(x1, tx1), 0.0)
        ih = jnp.maximum(jnp.minimum(y2, ty2) - jnp.maximum(y1, ty1), 0.0)
        inter = iw * ih
        denom = (x2 - x1) * (y2 - y1) + t_area - inter
        # 0/0 guard only fires on masked-out / padded cells (forward value
        # unchanged); exact divide keeps the iou1 > iou0 tie bit-exact.
        return inter / jnp.where(denom == 0.0, 1.0, denom)

    px0, py0, pw0, ph0, pc0 = P(0), P(1), P(2), P(3), P(4)
    px1, py1, pw1, ph1, pc1 = P(5), P(6), P(7), P(8), P(9)
    iou0 = iou_with_target(px0, py0, pw0, ph0)
    iou1 = iou_with_target(px1, py1, pw1, ph1)
    use2 = iou1 > iou0                          # strict >, ties go to box 0
    max_iou = jnp.where(use2, iou1, iou0)       # box_target_iou confidence

    # ---- get_contain_conf_loss
    dconf = jnp.where(use2, pc1, pc0) - max_iou
    contain_cell = jnp.where(has_obj, dconf * dconf, zero)

    # ---- get_regression_loss
    dx = jnp.where(use2, px1, px0) - jnp.where(use2, T(5), tx)
    dy = jnp.where(use2, py1, py0) - jnp.where(use2, T(6), ty)
    # NOTE: sqrt of non-positive predicted w/h in object cells would NaN —
    # same behavior as the PyTorch reference.
    dw = jnp.sqrt(jnp.where(use2, pw1, pw0)) - jnp.sqrt(jnp.where(use2, T(7), tw))
    dh = jnp.sqrt(jnp.where(use2, ph1, ph0)) - jnp.sqrt(jnp.where(use2, T(8), th))
    reg_cell = jnp.where(has_obj, dx * dx + dy * dy + dw * dw + dh * dh, zero)

    cell_loss = (l_coord * reg_cell + contain_cell
                 + l_noobj * noobj_cell + class_cell)       # (8, nb)

    # Fold lanes nb -> 128 in-kernel (lane-aligned static slices) so the HBM
    # writeback and the remaining wrapper reduction stay tiny.
    nb = cell_loss.shape[-1]
    part = cell_loss[:, 0:_LANE]
    for j in range(1, nb // _LANE):
        part = part + cell_loss[:, j * _LANE:(j + 1) * _LANE]
    out_ref[0] = part


@functools.partial(jax.jit, static_argnames=("S", "B", "l_coord", "l_noobj"))
def yolo_loss(pred_tensor, target_tensor, *, S, B, l_coord, l_noobj):
    """pred_tensor / target_tensor: (batch, S, S, B*5+20). Returns scalar loss."""
    assert B == 2, "reference PyTorch implementation assumes B == 2"
    N = pred_tensor.shape[0]
    D = B * 5 + 20
    C = N * S * S

    # Block sizing: aim for >= _MIN_BLOCKS grid steps (v7x two-TC sharding,
    # pipeline depth) with lane extent in [128, 512] (bounded live ranges).
    cells_target = -(-C // _MIN_BLOCKS)                 # cdiv
    nb = _round_up(max(1, -(-cells_target // 8)), _LANE)
    nb = max(_LANE, min(_MAX_NB, nb))
    cpb = 8 * nb                                        # cells per block
    G = -(-C // cpb)
    C_pad = G * cpb

    def to_slab(x):
        x = x.reshape(C, D)
        if x.dtype != jnp.float32:
            # TODO(synk): keep bf16 slabs ((16,128) tiles) and upcast in-kernel
            # to halve input DMA bytes; cast here is folded into the relayout.
            x = x.astype(jnp.float32)
        # Zero padding => padded cells have target conf 0 and zero diffs => 0 loss.
        x = jnp.pad(x, ((0, C_pad - C), (0, 0)))
        # Single relayout pass: (C_pad, 30) -> (G, 30, 8, nb).  Channels land on
        # a leading (untiled) dim, cells fill the (8, nb) minor dims, so every
        # in-kernel per-channel slice is a dense vreg tile.
        return x.reshape(G, 8, nb, D).transpose(0, 3, 1, 2)

    pred_s = to_slab(pred_tensor)
    targ_s = to_slab(target_tensor)

    kernel = functools.partial(_yolo_block_kernel, S=float(S),
                               l_coord=float(l_coord), l_noobj=float(l_noobj))

    parts = pl.pallas_call(
        kernel,
        out_shape=jax.ShapeDtypeStruct((G, 8, _LANE), jnp.float32),
        grid=(G,),
        in_specs=[pl.BlockSpec((1, D, 8, nb), lambda i: (i, 0, 0, 0)),
                  pl.BlockSpec((1, D, 8, nb), lambda i: (i, 0, 0, 0))],
        out_specs=pl.BlockSpec((1, 8, _LANE), lambda i: (i, 0, 0)),
        compiler_params=pltpu.CompilerParams(
            dimension_semantics=("parallel",)),
    )(pred_s, targ_s)

    # Tiny final reduction (G*1024 floats) + 1/N scaling — one fused XLA op.
    return jnp.sum(parts) / jnp.float32(N)


def _loss_ref(pred, targ, S, l_coord, l_noobj):
    """Pure-JAX reference in the original cell-major (batch,S,S,30) formulation."""
    N = pred.shape[0]
    D = pred.shape[-1]
    p = pred.reshape(-1, D).astype(jnp.float32)
    t = targ.reshape(-1, D).astype(jnp.float32)
    has_obj = t[:, 4] > 0.0
    no_obj = t[:, 4] == 0.0
    no_object_loss = jnp.sum(jnp.where(
        no_obj, (p[:, 4] - t[:, 4]) ** 2 + (p[:, 9] - t[:, 9]) ** 2, 0.0))
    class_loss = jnp.sum(jnp.where(
        has_obj[:, None], (p[:, 10:30] - t[:, 10:30]) ** 2, 0.0))

    def corners(b):
        x, y, w, h = b[:, 0], b[:, 1], b[:, 2], b[:, 3]
        return x / S - 0.5 * w, y / S - 0.5 * h, x / S + 0.5 * w, y / S + 0.5 * h

    def iou(b1, b2):
        x1, y1, x2, y2 = corners(b1)
        X1, Y1, X2, Y2 = corners(b2)
        iw = jnp.maximum(jnp.minimum(x2, X2) - jnp.maximum(x1, X1), 0.0)
        ih = jnp.maximum(jnp.minimum(y2, Y2) - jnp.maximum(y1, Y1), 0.0)
        inter = iw * ih
        denom = (x2 - x1) * (y2 - y1) + (X2 - X1) * (Y2 - Y1) - inter
        return inter / jnp.where(denom == 0.0, 1.0, denom)

    iou0 = iou(p[:, 0:4], t[:, 0:4])
    iou1 = iou(p[:, 5:9], t[:, 0:4])
    use2 = iou1 > iou0
    max_iou = jnp.where(use2, iou1, iou0)
    selp = jnp.where(use2[:, None], p[:, 5:10], p[:, 0:5])
    selt = jnp.where(use2[:, None], t[:, 5:10], t[:, 0:5])
    contain = jnp.sum(jnp.where(has_obj, (selp[:, 4] - max_iou) ** 2, 0.0))
    dw = jnp.sqrt(selp[:, 2]) - jnp.sqrt(selt[:, 2])
    dh = jnp.sqrt(selp[:, 3]) - jnp.sqrt(selt[:, 3])
    reg = jnp.sum(jnp.where(
        has_obj,
        (selp[:, 0] - selt[:, 0]) ** 2 + (selp[:, 1] - selt[:, 1]) ** 2
        + dw * dw + dh * dh, 0.0))
    return (l_coord * reg + contain + l_noobj * no_object_loss + class_loss) / N


if __name__ == "__main__":
    # Module hyperparameters (deterministic, in-script).
    S, B = 7, 2
    l_coord, l_noobj = 5.0, 0.5
    N = 2  # batch size

    key = jax.random.PRNGKey(0)
    k_pred, k_targ, k_obj = jax.random.split(key, 3)

    # Predictions / targets in (0.1, 0.9) so sqrt(w), sqrt(h) and IOU are well defined.
    pred = jax.random.uniform(k_pred, (N, S, S, 30), jnp.float32, 0.1, 0.9)
    targ = jax.random.uniform(k_targ, (N, S, S, 30), jnp.float32, 0.1, 0.9)
    # ~30% of cells contain an object (target confidence 1), the rest exactly 0.
    obj_mask = jax.random.bernoulli(k_obj, 0.3, (N, S, S))
    targ = targ.at[..., 4].set(jnp.where(obj_mask, 1.0, 0.0))

    loss = yolo_loss(pred, targ, S=S, B=B, l_coord=l_coord, l_noobj=l_noobj)
    loss = jax.block_until_ready(loss)

    # Pure-JAX reference in the original layout (checks the relayout, the
    # masked-math reformulation and the Pallas lowering).
    ref = _loss_ref(pred, targ, float(S), l_coord, l_noobj)
    assert jnp.allclose(loss, ref, rtol=1e-5, atol=1e-5), (loss, ref)

    print("KERNEL_OK")
</pallas_src>

<mosaic_0001>
module attributes {stable_mosaic.version = 11 : i64} {
  func.func @_yolo_block_kernel(%arg0: i32, %arg1: memref<1x30x8x128xf32, #tpu.memory_space<vmem>>, %arg2: memref<1x30x8x128xf32, #tpu.memory_space<vmem>>, %arg3: memref<1x8x128xf32, #tpu.memory_space<vmem>>) attributes {dimension_semantics = [#tpu.dimension_semantics<parallel>], iteration_bounds = array<i64: 1>, scalar_prefetch = 0 : i64, scratch_operands = 0 : i64, tpu.core_type = #tpu.core_type<tc>, window_params = [{transform_indices = @transform_0, window_bounds = array<i64: 1, 30, 8, 128>}, {transform_indices = @transform_1, window_bounds = array<i64: 1, 30, 8, 128>}, {transform_indices = @transform_2, window_bounds = array<i64: 1, 8, 128>}]} {
    %c0 = arith.constant 0 : index
    %c4 = arith.constant 4 : index
    %c0_0 = arith.constant 0 : index
    %c0_1 = arith.constant 0 : index
    %0 = vector.load %arg2[%c0, %c4, %c0_0, %c0_1] : memref<1x30x8x128xf32, #tpu.memory_space<vmem>>, vector<1x1x8x128xf32>
    %1 = vector.shape_cast %0 : vector<1x1x8x128xf32> to vector<8x128xf32>
    %cst = arith.constant 0.000000e+00 : f32
    %2 = vector.broadcast %cst : f32 to vector<8x128xf32>
    %3 = arith.cmpf ogt, %1, %2 : vector<8x128xf32>
    %cst_2 = arith.constant 0.000000e+00 : f32
    %4 = vector.broadcast %cst_2 : f32 to vector<8x128xf32>
    %c0_3 = arith.constant 0 : index
    %c4_4 = arith.constant 4 : index
    %c0_5 = arith.constant 0 : index
    %c0_6 = arith.constant 0 : index
    %5 = vector.load %arg1[%c0_3, %c4_4, %c0_5, %c0_6] : memref<1x30x8x128xf32, #tpu.memory_space<vmem>>, vector<1x1x8x128xf32>
    %6 = vector.shape_cast %5 : vector<1x1x8x128xf32> to vector<8x128xf32>
    %7 = arith.subf %6, %1 : vector<8x128xf32>
    %c0_7 = arith.constant 0 : index
    %c9 = arith.constant 9 : index
    %c0_8 = arith.constant 0 : index
    %c0_9 = arith.constant 0 : index
    %8 = vector.load %arg1[%c0_7, %c9, %c0_8, %c0_9] : memref<1x30x8x128xf32, #tpu.memory_space<vmem>>, vector<1x1x8x128xf32>
    %9 = vector.shape_cast %8 : vector<1x1x8x128xf32> to vector<8x128xf32>
    %c0_10 = arith.constant 0 : index
    %c9_11 = arith.constant 9 : index
    %c0_12 = arith.constant 0 : index
    %c0_13 = arith.constant 0 : index
    %10 = vector.load %arg2[%c0_10, %c9_11, %c0_12, %c0_13] : memref<1x30x8x128xf32, #tpu.memory_space<vmem>>, vector<1x1x8x128xf32>
    %11 = vector.shape_cast %10 : vector<1x1x8x128xf32> to vector<8x128xf32>
    %12 = arith.subf %9, %11 : vector<8x128xf32>
    %cst_14 = arith.constant 0.000000e+00 : f32
    %13 = vector.broadcast %cst_14 : f32 to vector<8x128xf32>
    %14 = arith.cmpf oeq, %1, %13 : vector<8x128xf32>
    %15 = arith.mulf %7, %7 : vector<8x128xf32>
    %16 = arith.mulf %12, %12 : vector<8x128xf32>
    %17 = arith.addf %15, %16 : vector<8x128xf32>
    %18 = arith.select %14, %17, %4 : vector<8x128xi1>, vector<8x128xf32>
    %c0_15 = arith.constant 0 : index
    %c10 = arith.constant 10 : index
    %c0_16 = arith.constant 0 : index
    %c0_17 = arith.constant 0 : index
    %19 = vector.load %arg1[%c0_15, %c10, %c0_16, %c0_17] : memref<1x30x8x128xf32, #tpu.memory_space<vmem>>, vector<1x1x8x128xf32>
    %20 = vector.shape_cast %19 : vector<1x1x8x128xf32> to vector<8x128xf32>
    %c0_18 = arith.constant 0 : index
    %c10_19 = arith.constant 10 : index
    %c0_20 = arith.constant 0 : index
    %c0_21 = arith.constant 0 : index
    %21 = vector.load %arg2[%c0_18, %c10_19, %c0_20, %c0_21] : memref<1x30x8x128xf32, #tpu.memory_space<vmem>>, vector<1x1x8x128xf32>
    %22 = vector.shape_cast %21 : vector<1x1x8x128xf32> to vector<8x128xf32>
    %23 = arith.subf %20, %22 : vector<8x128xf32>
    %24 = arith.mulf %23, %23 : vector<8x128xf32>
    %25 = arith.addf %4, %24 : vector<8x128xf32>
    %c0_22 = arith.constant 0 : index
    %c11 = arith.constant 11 : index
    %c0_23 = arith.constant 0 : index
    %c0_24 = arith.constant 0 : index
    %26 = vector.load %arg1[%c0_22, %c11, %c0_23, %c0_24] : memref<1x30x8x128xf32, #tpu.memory_space<vmem>>, vector<1x1x8x128xf32>
    %27 = vector.shape_cast %26 : vector<1x1x8x128xf32> to vector<8x128xf32>
    %c0_25 = arith.constant 0 : index
    %c11_26 = arith.constant 11 : index
    %c0_27 = arith.constant 0 : index
    %c0_28 = arith.constant 0 : index
    %28 = vector.load %arg2[%c0_25, %c11_26, %c0_27, %c0_28] : memref<1x30x8x128xf32, #tpu.memory_space<vmem>>, vector<1x1x8x128xf32>
    %29 = vector.shape_cast %28 : vector<1x1x8x128xf32> to vector<8x128xf32>
    %30 = arith.subf %27, %29 : vector<8x128xf32>
    %31 = arith.mulf %30, %30 : vector<8x128xf32>
    %32 = arith.addf %25, %31 : vector<8x128xf32>
    %c0_29 = arith.constant 0 : index
    %c12 = arith.constant 12 : index
    %c0_30 = arith.constant 0 : index
    %c0_31 = arith.constant 0 : index
    %33 = vector.load %arg1[%c0_29, %c12, %c0_30, %c0_31] : memref<1x30x8x128xf32, #tpu.memory_space<vmem>>, vector<1x1x8x128xf32>
    %34 = vector.shape_cast %33 : vector<1x1x8x128xf32> to vector<8x128xf32>
    %c0_32 = arith.constant 0 : index
    %c12_33 = arith.constant 12 : index
    %c0_34 = arith.constant 0 : index
    %c0_35 = arith.constant 0 : index
    %35 = vector.load %arg2[%c0_32, %c12_33, %c0_34, %c0_35] : memref<1x30x8x128xf32, #tpu.memory_space<vmem>>, vector<1x1x8x128xf32>
    %36 = vector.shape_cast %35 : vector<1x1x8x128xf32> to vector<8x128xf32>
    %37 = arith.subf %34, %36 : vector<8x128xf32>
    %38 = arith.mulf %37, %37 : vector<8x128xf32>
    %39 = arith.addf %32, %38 : vector<8x128xf32>
    %c0_36 = arith.constant 0 : index
    %c13 = arith.constant 13 : index
    %c0_37 = arith.constant 0 : index
    %c0_38 = arith.constant 0 : index
    %40 = vector.load %arg1[%c0_36, %c13, %c0_37, %c0_38] : memref<1x30x8x128xf32, #tpu.memory_space<vmem>>, vector<1x1x8x128xf32>
    %41 = vector.shape_cast %40 : vector<1x1x8x128xf32> to vector<8x128xf32>
    %c0_39 = arith.constant 0 : index
    %c13_40 = arith.constant 13 : index
    %c0_41 = arith.constant 0 : index
    %c0_42 = arith.constant 0 : index
    %42 = vector.load %arg2[%c0_39, %c13_40, %c0_41, %c0_42] : memref<1x30x8x128xf32, #tpu.memory_space<vmem>>, vector<1x1x8x128xf32>
    %43 = vector.shape_cast %42 : vector<1x1x8x128xf32> to vector<8x128xf32>
    %44 = arith.subf %41, %43 : vector<8x128xf32>
    %45 = arith.mulf %44, %44 : vector<8x128xf32>
    %46 = arith.addf %39, %45 : vector<8x128xf32>
    %c0_43 = arith.constant 0 : index
    %c14 = arith.constant 14 : index
    %c0_44 = arith.constant 0 : index
    %c0_45 = arith.constant 0 : index
    %47 = vector.load %arg1[%c0_43, %c14, %c0_44, %c0_45] : memref<1x30x8x128xf32, #tpu.memory_space<vmem>>, vector<1x1x8x128xf32>
    %48 = vector.shape_cast %47 : vector<1x1x8x128xf32> to vector<8x128xf32>
    %c0_46 = arith.constant 0 : index
    %c14_47 = arith.constant 14 : index
    %c0_48 = arith.constant 0 : index
    %c0_49 = arith.constant 0 : index
    %49 = vector.load %arg2[%c0_46, %c14_47, %c0_48, %c0_49] : memref<1x30x8x128xf32, #tpu.memory_space<vmem>>, vector<1x1x8x128xf32>
    %50 = vector.shape_cast %49 : vector<1x1x8x128xf32> to vector<8x128xf32>
    %51 = arith.subf %48, %50 : vector<8x128xf32>
    %52 = arith.mulf %51, %51 : vector<8x128xf32>
    %53 = arith.addf %46, %52 : vector<8x128xf32>
    %c0_50 = arith.constant 0 : index
    %c15 = arith.constant 15 : index
    %c0_51 = arith.constant 0 : index
    %c0_52 = arith.constant 0 : index
    %54 = vector.load %arg1[%c0_50, %c15, %c0_51, %c0_52] : memref<1x30x8x128xf32, #tpu.memory_space<vmem>>, vector<1x1x8x128xf32>
    %55 = vector.shape_cast %54 : vector<1x1x8x128xf32> to vector<8x128xf32>
    %c0_53 = arith.constant 0 : index
    %c15_54 = arith.constant 15 : index
    %c0_55 = arith.constant 0 : index
    %c0_56 = arith.constant 0 : index
    %56 = vector.load %arg2[%c0_53, %c15_54, %c0_55, %c0_56] : memref<1x30x8x128xf32, #tpu.memory_space<vmem>>, vector<1x1x8x128xf32>
    %57 = vector.shape_cast %56 : vector<1x1x8x128xf32> to vector<8x128xf32>
    %58 = arith.subf %55, %57 : vector<8x128xf32>
    %59 = arith.mulf %58, %58 : vector<8x128xf32>
    %60 = arith.addf %53, %59 : vector<8x128xf32>
    %c0_57 = arith.constant 0 : index
    %c16 = arith.constant 16 : index
    %c0_58 = arith.constant 0 : index
    %c0_59 = arith.constant 0 : index
    %61 = vector.load %arg1[%c0_57, %c16, %c0_58, %c0_59] : memref<1x30x8x128xf32, #tpu.memory_space<vmem>>, vector<1x1x8x128xf32>
    %62 = vector.shape_cast %61 : vector<1x1x8x128xf32> to vector<8x128xf32>
    %c0_60 = arith.constant 0 : index
    %c16_61 = arith.constant 16 : index
    %c0_62 = arith.constant 0 : index
    %c0_63 = arith.constant 0 : index
    %63 = vector.load %arg2[%c0_60, %c16_61, %c0_62, %c0_63] : memref<1x30x8x128xf32, #tpu.memory_space<vmem>>, vector<1x1x8x128xf32>
    %64 = vector.shape_cast %63 : vector<1x1x8x128xf32> to vector<8x128xf32>
    %65 = arith.subf %62, %64 : vector<8x128xf32>
    %66 = arith.mulf %65, %65 : vector<8x128xf32>
    %67 = arith.addf %60, %66 : vector<8x128xf32>
    %c0_64 = arith.constant 0 : index
    %c17 = arith.constant 17 : index
    %c0_65 = arith.constant 0 : index
    %c0_66 = arith.constant 0 : index
    %68 = vector.load %arg1[%c0_64, %c17, %c0_65, %c0_66] : memref<1x30x8x128xf32, #tpu.memory_space<vmem>>, vector<1x1x8x128xf32>
    %69 = vector.shape_cast %68 : vector<1x1x8x128xf32> to vector<8x128xf32>
    %c0_67 = arith.constant 0 : index
    %c17_68 = arith.constant 17 : index
    %c0_69 = arith.constant 0 : index
    %c0_70 = arith.constant 0 : index
    %70 = vector.load %arg2[%c0_67, %c17_68, %c0_69, %c0_70] : memref<1x30x8x128xf32, #tpu.memory_space<vmem>>, vector<1x1x8x128xf32>
    %71 = vector.shape_cast %70 : vector<1x1x8x128xf32> to vector<8x128xf32>
    %72 = arith.subf %69, %71 : vector<8x128xf32>
    %73 = arith.mulf %72, %72 : vector<8x128xf32>
    %74 = arith.addf %67, %73 : vector<8x128xf32>
    %c0_71 = arith.constant 0 : index
    %c18 = arith.constant 18 : index
    %c0_72 = arith.constant 0 : index
    %c0_73 = arith.constant 0 : index
    %75 = vector.load %arg1[%c0_71, %c18, %c0_72, %c0_73] : memref<1x30x8x128xf32, #tpu.memory_space<vmem>>, vector<1x1x8x128xf32>
    %76 = vector.shape_cast %75 : vector<1x1x8x128xf32> to vector<8x128xf32>
    %c0_74 = arith.constant 0 : index
    %c18_75 = arith.constant 18 : index
    %c0_76 = arith.constant 0 : index
    %c0_77 = arith.constant 0 : index
    %77 = vector.load %arg2[%c0_74, %c18_75, %c0_76, %c0_77] : memref<1x30x8x128xf32, #tpu.memory_space<vmem>>, vector<1x1x8x128xf32>
    %78 = vector.shape_cast %77 : vector<1x1x8x128xf32> to vector<8x128xf32>
    %79 = arith.subf %76, %78 : vector<8x128xf32>
    %80 = arith.mulf %79, %79 : vector<8x128xf32>
    %81 = arith.addf %74, %80 : vector<8x128xf32>
    %c0_78 = arith.constant 0 : index
    %c19 = arith.constant 19 : index
    %c0_79 = arith.constant 0 : index
    %c0_80 = arith.constant 0 : index
    %82 = vector.load %arg1[%c0_78, %c19, %c0_79, %c0_80] : memref<1x30x8x128xf32, #tpu.memory_space<vmem>>, vector<1x1x8x128xf32>
    %83 = vector.shape_cast %82 : vector<1x1x8x128xf32> to vector<8x128xf32>
    %c0_81 = arith.constant 0 : index
    %c19_82 = arith.constant 19 : index
    %c0_83 = arith.constant 0 : index
    %c0_84 = arith.constant 0 : index
    %84 = vector.load %arg2[%c0_81, %c19_82, %c0_83, %c0_84] : memref<1x30x8x128xf32, #tpu.memory_space<vmem>>, vector<1x1x8x128xf32>
    %85 = vector.shape_cast %84 : vector<1x1x8x128xf32> to vector<8x128xf32>
    %86 = arith.subf %83, %85 : vector<8x128xf32>
    %87 = arith.mulf %86, %86 : vector<8x128xf32>
    %88 = arith.addf %81, %87 : vector<8x128xf32>
    %c0_85 = arith.constant 0 : index
    %c20 = arith.constant 20 : index
    %c0_86 = arith.constant 0 : index
    %c0_87 = arith.constant 0 : index
    %89 = vector.load %arg1[%c0_85, %c20, %c0_86, %c0_87] : memref<1x30x8x128xf32, #tpu.memory_space<vmem>>, vector<1x1x8x128xf32>
    %90 = vector.shape_cast %89 : vector<1x1x8x128xf32> to vector<8x128xf32>
    %c0_88 = arith.constant 0 : index
    %c20_89 = arith.constant 20 : index
    %c0_90 = arith.constant 0 : index
    %c0_91 = arith.constant 0 : index
    %91 = vector.load %arg2[%c0_88, %c20_89, %c0_90, %c0_91] : memref<1x30x8x128xf32, #tpu.memory_space<vmem>>, vector<1x1x8x128xf32>
    %92 = vector.shape_cast %91 : vector<1x1x8x128xf32> to vector<8x128xf32>
    %93 = arith.subf %90, %92 : vector<8x128xf32>
    %94 = arith.mulf %93, %93 : vector<8x128xf32>
    %95 = arith.addf %88, %94 : vector<8x128xf32>
    %c0_92 = arith.constant 0 : index
    %c21 = arith.constant 21 : index
    %c0_93 = arith.constant 0 : index
    %c0_94 = arith.constant 0 : index
    %96 = vector.load %arg1[%c0_92, %c21, %c0_93, %c0_94] : memref<1x30x8x128xf32, #tpu.memory_space<vmem>>, vector<1x1x8x128xf32>
    %97 = vector.shape_cast %96 : vector<1x1x8x128xf32> to vector<8x128xf32>
    %c0_95 = arith.constant 0 : index
    %c21_96 = arith.constant 21 : index
    %c0_97 = arith.constant 0 : index
    %c0_98 = arith.constant 0 : index
    %98 = vector.load %arg2[%c0_95, %c21_96, %c0_97, %c0_98] : memref<1x30x8x128xf32, #tpu.memory_space<vmem>>, vector<1x1x8x128xf32>
    %99 = vector.shape_cast %98 : vector<1x1x8x128xf32> to vector<8x128xf32>
    %100 = arith.subf %97, %99 : vector<8x128xf32>
    %101 = arith.mulf %100, %100 : vector<8x128xf32>
    %102 = arith.addf %95, %101 : vector<8x128xf32>
    %c0_99 = arith.constant 0 : index
    %c22 = arith.constant 22 : index
    %c0_100 = arith.constant 0 : index
    %c0_101 = arith.constant 0 : index
    %103 = vector.load %arg1[%c0_99, %c22, %c0_100, %c0_101] : memref<1x30x8x128xf32, #tpu.memory_space<vmem>>, vector<1x1x8x128xf32>
    %104 = vector.shape_cast %103 : vector<1x1x8x128xf32> to vector<8x128xf32>
    %c0_102 = arith.constant 0 : index
    %c22_103 = arith.constant 22 : index
    %c0_104 = arith.constant 0 : index
    %c0_105 = arith.constant 0 : index
    %105 = vector.load %arg2[%c0_102, %c22_103, %c0_104, %c0_105] : memref<1x30x8x128xf32, #tpu.memory_space<vmem>>, vector<1x1x8x128xf32>
    %106 = vector.shape_cast %105 : vector<1x1x8x128xf32> to vector<8x128xf32>
    %107 = arith.subf %104, %106 : vector<8x128xf32>
    %108 = arith.mulf %107, %107 : vector<8x128xf32>
    %109 = arith.addf %102, %108 : vector<8x128xf32>
    %c0_106 = arith.constant 0 : index
    %c23 = arith.constant 23 : index
    %c0_107 = arith.constant 0 : index
    %c0_108 = arith.constant 0 : index
    %110 = vector.load %arg1[%c0_106, %c23, %c0_107, %c0_108] : memref<1x30x8x128xf32, #tpu.memory_space<vmem>>, vector<1x1x8x128xf32>
    %111 = vector.shape_cast %110 : vector<1x1x8x128xf32> to vector<8x128xf32>
    %c0_109 = arith.constant 0 : index
    %c23_110 = arith.constant 23 : index
    %c0_111 = arith.constant 0 : index
    %c0_112 = arith.constant 0 : index
    %112 = vector.load %arg2[%c0_109, %c23_110, %c0_111, %c0_112] : memref<1x30x8x128xf32, #tpu.memory_space<vmem>>, vector<1x1x8x128xf32>
    %113 = vector.shape_cast %112 : vector<1x1x8x128xf32> to vector<8x128xf32>
    %114 = arith.subf %111, %113 : vector<8x128xf32>
    %115 = arith.mulf %114, %114 : vector<8x128xf32>
    %116 = arith.addf %109, %115 : vector<8x128xf32>
    %c0_113 = arith.constant 0 : index
    %c24 = arith.constant 24 : index
    %c0_114 = arith.constant 0 : index
    %c0_115 = arith.constant 0 : index
    %117 = vector.load %arg1[%c0_113, %c24, %c0_114, %c0_115] : memref<1x30x8x128xf32, #tpu.memory_space<vmem>>, vector<1x1x8x128xf32>
    %118 = vector.shape_cast %117 : vector<1x1x8x128xf32> to vector<8x128xf32>
    %c0_116 = arith.constant 0 : index
    %c24_117 = arith.constant 24 : index
    %c0_118 = arith.constant 0 : index
    %c0_119 = arith.constant 0 : index
    %119 = vector.load %arg2[%c0_116, %c24_117, %c0_118, %c0_119] : memref<1x30x8x128xf32, #tpu.memory_space<vmem>>, vector<1x1x8x128xf32>
    %120 = vector.shape_cast %119 : vector<1x1x8x128xf32> to vector<8x128xf32>
    %121 = arith.subf %118, %120 : vector<8x128xf32>
    %122 = arith.mulf %121, %121 : vector<8x128xf32>
    %123 = arith.addf %116, %122 : vector<8x128xf32>
    %c0_120 = arith.constant 0 : index
    %c25 = arith.constant 25 : index
    %c0_121 = arith.constant 0 : index
    %c0_122 = arith.constant 0 : index
    %124 = vector.load %arg1[%c0_120, %c25, %c0_121, %c0_122] : memref<1x30x8x128xf32, #tpu.memory_space<vmem>>, vector<1x1x8x128xf32>
    %125 = vector.shape_cast %124 : vector<1x1x8x128xf32> to vector<8x128xf32>
    %c0_123 = arith.constant 0 : index
    %c25_124 = arith.constant 25 : index
    %c0_125 = arith.constant 0 : index
    %c0_126 = arith.constant 0 : index
    %126 = vector.load %arg2[%c0_123, %c25_124, %c0_125, %c0_126] : memref<1x30x8x128xf32, #tpu.memory_space<vmem>>, vector<1x1x8x128xf32>
    %127 = vector.shape_cast %126 : vector<1x1x8x128xf32> to vector<8x128xf32>
    %128 = arith.subf %125, %127 : vector<8x128xf32>
    %129 = arith.mulf %128, %128 : vector<8x128xf32>
    %130 = arith.addf %123, %129 : vector<8x128xf32>
    %c0_127 = arith.constant 0 : index
    %c26 = arith.constant 26 : index
    %c0_128 = arith.constant 0 : index
    %c0_129 = arith.constant 0 : index
    %131 = vector.load %arg1[%c0_127, %c26, %c0_128, %c0_129] : memref<1x30x8x128xf32, #tpu.memory_space<vmem>>, vector<1x1x8x128xf32>
    %132 = vector.shape_cast %131 : vector<1x1x8x128xf32> to vector<8x128xf32>
    %c0_130 = arith.constant 0 : index
    %c26_131 = arith.constant 26 : index
    %c0_132 = arith.constant 0 : index
    %c0_133 = arith.constant 0 : index
    %133 = vector.load %arg2[%c0_130, %c26_131, %c0_132, %c0_133] : memref<1x30x8x128xf32, #tpu.memory_space<vmem>>, vector<1x1x8x128xf32>
    %134 = vector.shape_cast %133 : vector<1x1x8x128xf32> to vector<8x128xf32>
    %135 = arith.subf %132, %134 : vector<8x128xf32>
    %136 = arith.mulf %135, %135 : vector<8x128xf32>
    %137 = arith.addf %130, %136 : vector<8x128xf32>
    %c0_134 = arith.constant 0 : index
    %c27 = arith.constant 27 : index
    %c0_135 = arith.constant 0 : index
    %c0_136 = arith.constant 0 : index
    %138 = vector.load %arg1[%c0_134, %c27, %c0_135, %c0_136] : memref<1x30x8x128xf32, #tpu.memory_space<vmem>>, vector<1x1x8x128xf32>
    %139 = vector.shape_cast %138 : vector<1x1x8x128xf32> to vector<8x128xf32>
    %c0_137 = arith.constant 0 : index
    %c27_138 = arith.constant 27 : index
    %c0_139 = arith.constant 0 : index
    %c0_140 = arith.constant 0 : index
    %140 = vector.load %arg2[%c0_137, %c27_138, %c0_139, %c0_140] : memref<1x30x8x128xf32, #tpu.memory_space<vmem>>, vector<1x1x8x128xf32>
    %141 = vector.shape_cast %140 : vector<1x1x8x128xf32> to vector<8x128xf32>
    %142 = arith.subf %139, %141 : vector<8x128xf32>
    %143 = arith.mulf %142, %142 : vector<8x128xf32>
    %144 = arith.addf %137, %143 : vector<8x128xf32>
    %c0_141 = arith.constant 0 : index
    %c28 = arith.constant 28 : index
    %c0_142 = arith.constant 0 : index
    %c0_143 = arith.constant 0 : index
    %145 = vector.load %arg1[%c0_141, %c28, %c0_142, %c0_143] : memref<1x30x8x128xf32, #tpu.memory_space<vmem>>, vector<1x1x8x128xf32>
    %146 = vector.shape_cast %145 : vector<1x1x8x128xf32> to vector<8x128xf32>
    %c0_144 = arith.constant 0 : index
    %c28_145 = arith.constant 28 : index
    %c0_146 = arith.constant 0 : index
    %c0_147 = arith.constant 0 : index
    %147 = vector.load %arg2[%c0_144, %c28_145, %c0_146, %c0_147] : memref<1x30x8x128xf32, #tpu.memory_space<vmem>>, vector<1x1x8x128xf32>
    %148 = vector.shape_cast %147 : vector<1x1x8x128xf32> to vector<8x128xf32>
    %149 = arith.subf %146, %148 : vector<8x128xf32>
    %150 = arith.mulf %149, %149 : vector<8x128xf32>
    %151 = arith.addf %144, %150 : vector<8x128xf32>
    %c0_148 = arith.constant 0 : index
    %c29 = arith.constant 29 : index
    %c0_149 = arith.constant 0 : index
    %c0_150 = arith.constant 0 : index
    %152 = vector.load %arg1[%c0_148, %c29, %c0_149, %c0_150] : memref<1x30x8x128xf32, #tpu.memory_space<vmem>>, vector<1x1x8x128xf32>
    %153 = vector.shape_cast %152 : vector<1x1x8x128xf32> to vector<8x128xf32>
    %c0_151 = arith.constant 0 : index
    %c29_152 = arith.constant 29 : index
    %c0_153 = arith.constant 0 : index
    %c0_154 = arith.constant 0 : index
    %154 = vector.load %arg2[%c0_151, %c29_152, %c0_153, %c0_154] : memref<1x30x8x128xf32, #tpu.memory_space<vmem>>, vector<1x1x8x128xf32>
    %155 = vector.shape_cast %154 : vector<1x1x8x128xf32> to vector<8x128xf32>
    %156 = arith.subf %153, %155 : vector<8x128xf32>
    %157 = arith.mulf %156, %156 : vector<8x128xf32>
    %158 = arith.addf %151, %157 : vector<8x128xf32>
    %159 = arith.select %3, %158, %4 : vector<8x128xi1>, vector<8x128xf32>
    %c0_155 = arith.constant 0 : index
    %c0_156 = arith.constant 0 : index
    %c0_157 = arith.constant 0 : index
    %c0_158 = arith.constant 0 : index
    %160 = vector.load %arg2[%c0_155, %c0_156, %c0_157, %c0_158] : memref<1x30x8x128xf32, #tpu.memory_space<vmem>>, vector<1x1x8x128xf32>
    %161 = vector.shape_cast %160 : vector<1x1x8x128xf32> to vector<8x128xf32>
    %c0_159 = arith.constant 0 : index
    %c1 = arith.constant 1 : index
    %c0_160 = arith.constant 0 : index
    %c0_161 = arith.constant 0 : index
    %162 = vector.load %arg2[%c0_159, %c1, %c0_160, %c0_161] : memref<1x30x8x128xf32, #tpu.memory_space<vmem>>, vector<1x1x8x128xf32>
    %163 = vector.shape_cast %162 : vector<1x1x8x128xf32> to vector<8x128xf32>
    %c0_162 = arith.constant 0 : index
    %c2 = arith.constant 2 : index
    %c0_163 = arith.constant 0 : index
    %c0_164 = arith.constant 0 : index
    %164 = vector.load %arg2[%c0_162, %c2, %c0_163, %c0_164] : memref<1x30x8x128xf32, #tpu.memory_space<vmem>>, vector<1x1x8x128xf32>
    %165 = vector.shape_cast %164 : vector<1x1x8x128xf32> to vector<8x128xf32>
    %c0_165 = arith.constant 0 : index
    %c3 = arith.constant 3 : index
    %c0_166 = arith.constant 0 : index
    %c0_167 = arith.constant 0 : index
    %166 = vector.load %arg2[%c0_165, %c3, %c0_166, %c0_167] : memref<1x30x8x128xf32, #tpu.memory_space<vmem>>, vector<1x1x8x128xf32>
    %167 = vector.shape_cast %166 : vector<1x1x8x128xf32> to vector<8x128xf32>
    %cst_168 = arith.constant 7.000000e+00 : f32
    %168 = vector.broadcast %cst_168 : f32 to vector<8x128xf32>
    %169 = arith.divf %161, %168 : vector<8x128xf32>
    %cst_169 = arith.constant 5.000000e-01 : f32
    %170 = vector.broadcast %cst_169 : f32 to vector<8x128xf32>
    %171 = arith.mulf %170, %165 : vector<8x128xf32>
    %172 = arith.subf %169, %171 : vector<8x128xf32>
    %cst_170 = arith.constant 7.000000e+00 : f32
    %173 = vector.broadcast %cst_170 : f32 to vector<8x128xf32>
    %174 = arith.divf %163, %173 : vector<8x128xf32>
    %cst_171 = arith.constant 5.000000e-01 : f32
    %175 = vector.broadcast %cst_171 : f32 to vector<8x128xf32>
    %176 = arith.mulf %175, %167 : vector<8x128xf32>
    %177 = arith.subf %174, %176 : vector<8x128xf32>
    %cst_172 = arith.constant 7.000000e+00 : f32
    %178 = vector.broadcast %cst_172 : f32 to vector<8x128xf32>
    %179 = arith.divf %161, %178 : vector<8x128xf32>
    %cst_173 = arith.constant 5.000000e-01 : f32
    %180 = vector.broadcast %cst_173 : f32 to vector<8x128xf32>
    %181 = arith.mulf %180, %165 : vector<8x128xf32>
    %182 = arith.addf %179, %181 : vector<8x128xf32>
    %cst_174 = arith.constant 7.000000e+00 : f32
    %183 = vector.broadcast %cst_174 : f32 to vector<8x128xf32>
    %184 = arith.divf %163, %183 : vector<8x128xf32>
    %cst_175 = arith.constant 5.000000e-01 : f32
    %185 = vector.broadcast %cst_175 : f32 to vector<8x128xf32>
    %186 = arith.mulf %185, %167 : vector<8x128xf32>
    %187 = arith.addf %184, %186 : vector<8x128xf32>
    %188 = arith.subf %182, %172 : vector<8x128xf32>
    %189 = arith.subf %187, %177 : vector<8x128xf32>
    %190 = arith.mulf %188, %189 : vector<8x128xf32>
    %c0_176 = arith.constant 0 : index
    %c0_177 = arith.constant 0 : index
    %c0_178 = arith.constant 0 : index
    %c0_179 = arith.constant 0 : index
    %191 = vector.load %arg1[%c0_176, %c0_177, %c0_178, %c0_179] : memref<1x30x8x128xf32, #tpu.memory_space<vmem>>, vector<1x1x8x128xf32>
    %192 = vector.shape_cast %191 : vector<1x1x8x128xf32> to vector<8x128xf32>
    %c0_180 = arith.constant 0 : index
    %c1_181 = arith.constant 1 : index
    %c0_182 = arith.constant 0 : index
    %c0_183 = arith.constant 0 : index
    %193 = vector.load %arg1[%c0_180, %c1_181, %c0_182, %c0_183] : memref<1x30x8x128xf32, #tpu.memory_space<vmem>>, vector<1x1x8x128xf32>
    %194 = vector.shape_cast %193 : vector<1x1x8x128xf32> to vector<8x128xf32>
    %c0_184 = arith.constant 0 : index
    %c2_185 = arith.constant 2 : index
    %c0_186 = arith.constant 0 : index
    %c0_187 = arith.constant 0 : index
    %195 = vector.load %arg1[%c0_184, %c2_185, %c0_186, %c0_187] : memref<1x30x8x128xf32, #tpu.memory_space<vmem>>, vector<1x1x8x128xf32>
    %196 = vector.shape_cast %195 : vector<1x1x8x128xf32> to vector<8x128xf32>
    %c0_188 = arith.constant 0 : index
    %c3_189 = arith.constant 3 : index
    %c0_190 = arith.constant 0 : index
    %c0_191 = arith.constant 0 : index
    %197 = vector.load %arg1[%c0_188, %c3_189, %c0_190, %c0_191] : memref<1x30x8x128xf32, #tpu.memory_space<vmem>>, vector<1x1x8x128xf32>
    %198 = vector.shape_cast %197 : vector<1x1x8x128xf32> to vector<8x128xf32>
    %c0_192 = arith.constant 0 : index
    %c4_193 = arith.constant 4 : index
    %c0_194 = arith.constant 0 : index
    %c0_195 = arith.constant 0 : index
    %199 = vector.load %arg1[%c0_192, %c4_193, %c0_194, %c0_195] : memref<1x30x8x128xf32, #tpu.memory_space<vmem>>, vector<1x1x8x128xf32>
    %200 = vector.shape_cast %199 : vector<1x1x8x128xf32> to vector<8x128xf32>
    %c0_196 = arith.constant 0 : index
    %c5 = arith.constant 5 : index
    %c0_197 = arith.constant 0 : index
    %c0_198 = arith.constant 0 : index
    %201 = vector.load %arg1[%c0_196, %c5, %c0_197, %c0_198] : memref<1x30x8x128xf32, #tpu.memory_space<vmem>>, vector<1x1x8x128xf32>
    %202 = vector.shape_cast %201 : vector<1x1x8x128xf32> to vector<8x128xf32>
    %c0_199 = arith.constant 0 : index
    %c6 = arith.constant 6 : index
    %c0_200 = arith.constant 0 : index
    %c0_201 = arith.constant 0 : index
    %203 = vector.load %arg1[%c0_199, %c6, %c0_200, %c0_201] : memref<1x30x8x128xf32, #tpu.memory_space<vmem>>, vector<1x1x8x128xf32>
    %204 = vector.shape_cast %203 : vector<1x1x8x128xf32> to vector<8x128xf32>
    %c0_202 = arith.constant 0 : index
    %c7 = arith.constant 7 : index
    %c0_203 = arith.constant 0 : index
    %c0_204 = arith.constant 0 : index
    %205 = vector.load %arg1[%c0_202, %c7, %c0_203, %c0_204] : memref<1x30x8x128xf32, #tpu.memory_space<vmem>>, vector<1x1x8x128xf32>
    %206 = vector.shape_cast %205 : vector<1x1x8x128xf32> to vector<8x128xf32>
    %c0_205 = arith.constant 0 : index
    %c8 = arith.constant 8 : index
    %c0_206 = arith.constant 0 : index
    %c0_207 = arith.constant 0 : index
    %207 = vector.load %arg1[%c0_205, %c8, %c0_206, %c0_207] : memref<1x30x8x128xf32, #tpu.memory_space<vmem>>, vector<1x1x8x128xf32>
    %208 = vector.shape_cast %207 : vector<1x1x8x128xf32> to vector<8x128xf32>
    %c0_208 = arith.constant 0 : index
    %c9_209 = arith.constant 9 : index
    %c0_210 = arith.constant 0 : index
    %c0_211 = arith.constant 0 : index
    %209 = vector.load %arg1[%c0_208, %c9_209, %c0_210, %c0_211] : memref<1x30x8x128xf32, #tpu.memory_space<vmem>>, vector<1x1x8x128xf32>
    %210 = vector.shape_cast %209 : vector<1x1x8x128xf32> to vector<8x128xf32>
    %cst_212 = arith.constant 7.000000e+00 : f32
    %211 = vector.broadcast %cst_212 : f32 to vector<8x128xf32>
    %212 = arith.divf %192, %211 : vector<8x128xf32>
    %cst_213 = arith.constant 5.000000e-01 : f32
    %213 = vector.broadcast %cst_213 : f32 to vector<8x128xf32>
    %214 = arith.mulf %213, %196 : vector<8x128xf32>
    %215 = arith.subf %212, %214 : vector<8x128xf32>
    %cst_214 = arith.constant 7.000000e+00 : f32
    %216 = vector.broadcast %cst_214 : f32 to vector<8x128xf32>
    %217 = arith.divf %194, %216 : vector<8x128xf32>
    %cst_215 = arith.constant 5.000000e-01 : f32
    %218 = vector.broadcast %cst_215 : f32 to vector<8x128xf32>
    %219 = arith.mulf %218, %198 : vector<8x128xf32>
    %220 = arith.subf %217, %219 : vector<8x128xf32>
    %cst_216 = arith.constant 7.000000e+00 : f32
    %221 = vector.broadcast %cst_216 : f32 to vector<8x128xf32>
    %222 = arith.divf %192, %221 : vector<8x128xf32>
    %cst_217 = arith.constant 5.000000e-01 : f32
    %223 = vector.broadcast %cst_217 : f32 to vector<8x128xf32>
    %224 = arith.mulf %223, %196 : vector<8x128xf32>
    %225 = arith.addf %222, %224 : vector<8x128xf32>
    %cst_218 = arith.constant 7.000000e+00 : f32
    %226 = vector.broadcast %cst_218 : f32 to vector<8x128xf32>
    %227 = arith.divf %194, %226 : vector<8x128xf32>
    %cst_219 = arith.constant 5.000000e-01 : f32
    %228 = vector.broadcast %cst_219 : f32 to vector<8x128xf32>
    %229 = arith.mulf %228, %198 : vector<8x128xf32>
    %230 = arith.addf %227, %229 : vector<8x128xf32>
    %231 = arith.minimumf %225, %182 : vector<8x128xf32>
    %232 = arith.maximumf %215, %172 : vector<8x128xf32>
    %233 = arith.subf %231, %232 : vector<8x128xf32>
    %cst_220 = arith.constant 0.000000e+00 : f32
    %234 = vector.broadcast %cst_220 : f32 to vector<8x128xf32>
    %235 = arith.maximumf %233, %234 : vector<8x128xf32>
    %236 = arith.minimumf %230, %187 : vector<8x128xf32>
    %237 = arith.maximumf %220, %177 : vector<8x128xf32>
    %238 = arith.subf %236, %237 : vector<8x128xf32>
    %cst_221 = arith.constant 0.000000e+00 : f32
    %239 = vector.broadcast %cst_221 : f32 to vector<8x128xf32>
    %240 = arith.maximumf %238, %239 : vector<8x128xf32>
    %241 = arith.mulf %235, %240 : vector<8x128xf32>
    %242 = arith.subf %225, %215 : vector<8x128xf32>
    %243 = arith.subf %230, %220 : vector<8x128xf32>
    %244 = arith.mulf %242, %243 : vector<8x128xf32>
    %245 = arith.addf %244, %190 : vector<8x128xf32>
    %246 = arith.subf %245, %241 : vector<8x128xf32>
    %cst_222 = arith.constant 0.000000e+00 : f32
    %247 = vector.broadcast %cst_222 : f32 to vector<8x128xf32>
    %248 = arith.cmpf oeq, %246, %247 : vector<8x128xf32>
    %cst_223 = arith.constant 1.000000e+00 : f32
    %249 = vector.broadcast %cst_223 : f32 to vector<8x128xf32>
    %250 = arith.select %248, %249, %246 : vector<8x128xi1>, vector<8x128xf32>
    %251 = arith.divf %241, %250 : vector<8x128xf32>
    %cst_224 = arith.constant 7.000000e+00 : f32
    %252 = vector.broadcast %cst_224 : f32 to vector<8x128xf32>
    %253 = arith.divf %202, %252 : vector<8x128xf32>
    %cst_225 = arith.constant 5.000000e-01 : f32
    %254 = vector.broadcast %cst_225 : f32 to vector<8x128xf32>
    %255 = arith.mulf %254, %206 : vector<8x128xf32>
    %256 = arith.subf %253, %255 : vector<8x128xf32>
    %cst_226 = arith.constant 7.000000e+00 : f32
    %257 = vector.broadcast %cst_226 : f32 to vector<8x128xf32>
    %258 = arith.divf %204, %257 : vector<8x128xf32>
    %cst_227 = arith.constant 5.000000e-01 : f32
    %259 = vector.broadcast %cst_227 : f32 to vector<8x128xf32>
    %260 = arith.mulf %259, %208 : vector<8x128xf32>
    %261 = arith.subf %258, %260 : vector<8x128xf32>
    %cst_228 = arith.constant 7.000000e+00 : f32
    %262 = vector.broadcast %cst_228 : f32 to vector<8x128xf32>
    %263 = arith.divf %202, %262 : vector<8x128xf32>
    %cst_229 = arith.constant 5.000000e-01 : f32
    %264 = vector.broadcast %cst_229 : f32 to vector<8x128xf32>
    %265 = arith.mulf %264, %206 : vector<8x128xf32>
    %266 = arith.addf %263, %265 : vector<8x128xf32>
    %cst_230 = arith.constant 7.000000e+00 : f32
    %267 = vector.broadcast %cst_230 : f32 to vector<8x128xf32>
    %268 = arith.divf %204, %267 : vector<8x128xf32>
    %cst_231 = arith.constant 5.000000e-01 : f32
    %269 = vector.broadcast %cst_231 : f32 to vector<8x128xf32>
    %270 = arith.mulf %269, %208 : vector<8x128xf32>
    %271 = arith.addf %268, %270 : vector<8x128xf32>
    %272 = arith.minimumf %266, %182 : vector<8x128xf32>
    %273 = arith.maximumf %256, %172 : vector<8x128xf32>
    %274 = arith.subf %272, %273 : vector<8x128xf32>
    %cst_232 = arith.constant 0.000000e+00 : f32
    %275 = vector.broadcast %cst_232 : f32 to vector<8x128xf32>
    %276 = arith.maximumf %274, %275 : vector<8x128xf32>
    %277 = arith.minimumf %271, %187 : vector<8x128xf32>
    %278 = arith.maximumf %261, %177 : vector<8x128xf32>
    %279 = arith.subf %277, %278 : vector<8x128xf32>
    %cst_233 = arith.constant 0.000000e+00 : f32
    %280 = vector.broadcast %cst_233 : f32 to vector<8x128xf32>
    %281 = arith.maximumf %279, %280 : vector<8x128xf32>
    %282 = arith.mulf %276, %281 : vector<8x128xf32>
    %283 = arith.subf %266, %256 : vector<8x128xf32>
    %284 = arith.subf %271, %261 : vector<8x128xf32>
    %285 = arith.mulf %283, %284 : vector<8x128xf32>
    %286 = arith.addf %285, %190 : vector<8x128xf32>
    %287 = arith.subf %286, %282 : vector<8x128xf32>
    %cst_234 = arith.constant 0.000000e+00 : f32
    %288 = vector.broadcast %cst_234 : f32 to vector<8x128xf32>
    %289 = arith.cmpf oeq, %287, %288 : vector<8x128xf32>
    %cst_235 = arith.constant 1.000000e+00 : f32
    %290 = vector.broadcast %cst_235 : f32 to vector<8x128xf32>
    %291 = arith.select %289, %290, %287 : vector<8x128xi1>, vector<8x128xf32>
    %292 = arith.divf %282, %291 : vector<8x128xf32>
    %293 = arith.cmpf ogt, %292, %251 : vector<8x128xf32>
    %294 = arith.select %293, %292, %251 : vector<8x128xi1>, vector<8x128xf32>
    %295 = arith.select %293, %210, %200 : vector<8x128xi1>, vector<8x128xf32>
    %296 = arith.subf %295, %294 : vector<8x128xf32>
    %297 = arith.mulf %296, %296 : vector<8x128xf32>
    %298 = arith.select %3, %297, %4 : vector<8x128xi1>, vector<8x128xf32>
    %299 = arith.select %293, %202, %192 : vector<8x128xi1>, vector<8x128xf32>
    %c0_236 = arith.constant 0 : index
    %c5_237 = arith.constant 5 : index
    %c0_238 = arith.constant 0 : index
    %c0_239 = arith.constant 0 : index
    %300 = vector.load %arg2[%c0_236, %c5_237, %c0_238, %c0_239] : memref<1x30x8x128xf32, #tpu.memory_space<vmem>>, vector<1x1x8x128xf32>
    %301 = vector.shape_cast %300 : vector<1x1x8x128xf32> to vector<8x128xf32>
    %302 = arith.select %293, %301, %161 : vector<8x128xi1>, vector<8x128xf32>
    %303 = arith.subf %299, %302 : vector<8x128xf32>
    %304 = arith.select %293, %204, %194 : vector<8x128xi1>, vector<8x128xf32>
    %c0_240 = arith.constant 0 : index
    %c6_241 = arith.constant 6 : index
    %c0_242 = arith.constant 0 : index
    %c0_243 = arith.constant 0 : index
    %305 = vector.load %arg2[%c0_240, %c6_241, %c0_242, %c0_243] : memref<1x30x8x128xf32, #tpu.memory_space<vmem>>, vector<1x1x8x128xf32>
    %306 = vector.shape_cast %305 : vector<1x1x8x128xf32> to vector<8x128xf32>
    %307 = arith.select %293, %306, %163 : vector<8x128xi1>, vector<8x128xf32>
    %308 = arith.subf %304, %307 : vector<8x128xf32>
    %309 = arith.select %293, %206, %196 : vector<8x128xi1>, vector<8x128xf32>
    %310 = math.sqrt %309 : vector<8x128xf32>
    %c0_244 = arith.constant 0 : index
    %c7_245 = arith.constant 7 : index
    %c0_246 = arith.constant 0 : index
    %c0_247 = arith.constant 0 : index
    %311 = vector.load %arg2[%c0_244, %c7_245, %c0_246, %c0_247] : memref<1x30x8x128xf32, #tpu.memory_space<vmem>>, vector<1x1x8x128xf32>
    %312 = vector.shape_cast %311 : vector<1x1x8x128xf32> to vector<8x128xf32>
    %313 = arith.select %293, %312, %165 : vector<8x128xi1>, vector<8x128xf32>
    %314 = math.sqrt %313 : vector<8x128xf32>
    %315 = arith.subf %310, %314 : vector<8x128xf32>
    %316 = arith.select %293, %208, %198 : vector<8x128xi1>, vector<8x128xf32>
    %317 = math.sqrt %316 : vector<8x128xf32>
    %c0_248 = arith.constant 0 : index
    %c8_249 = arith.constant 8 : index
    %c0_250 = arith.constant 0 : index
    %c0_251 = arith.constant 0 : index
    %318 = vector.load %arg2[%c0_248, %c8_249, %c0_250, %c0_251] : memref<1x30x8x128xf32, #tpu.memory_space<vmem>>, vector<1x1x8x128xf32>
    %319 = vector.shape_cast %318 : vector<1x1x8x128xf32> to vector<8x128xf32>
    %320 = arith.select %293, %319, %167 : vector<8x128xi1>, vector<8x128xf32>
    %321 = math.sqrt %320 : vector<8x128xf32>
    %322 = arith.subf %317, %321 : vector<8x128xf32>
    %323 = arith.mulf %303, %303 : vector<8x128xf32>
    %324 = arith.mulf %308, %308 : vector<8x128xf32>
    %325 = arith.addf %323, %324 : vector<8x128xf32>
    %326 = arith.mulf %315, %315 : vector<8x128xf32>
    %327 = arith.addf %325, %326 : vector<8x128xf32>
    %328 = arith.mulf %322, %322 : vector<8x128xf32>
    %329 = arith.addf %327, %328 : vector<8x128xf32>
    %330 = arith.select %3, %329, %4 : vector<8x128xi1>, vector<8x128xf32>
    %cst_252 = arith.constant 5.000000e+00 : f32
    %331 = vector.broadcast %cst_252 : f32 to vector<8x128xf32>
    %332 = arith.mulf %331, %330 : vector<8x128xf32>
    %333 = arith.addf %332, %298 : vector<8x128xf32>
    %cst_253 = arith.constant 5.000000e-01 : f32
    %334 = vector.broadcast %cst_253 : f32 to vector<8x128xf32>
    %335 = arith.mulf %334, %18 : vector<8x128xf32>
    %336 = arith.addf %333, %335 : vector<8x128xf32>
    %337 = arith.addf %336, %159 : vector<8x128xf32>
    %c0_254 = arith.constant 0 : index
    %c0_255 = arith.constant 0 : index
    %c0_256 = arith.constant 0 : index
    %338 = vector.load %arg3[%c0_254, %c0_255, %c0_256] : memref<1x8x128xf32, #tpu.memory_space<vmem>>, vector<1x8x128xf32>
    %339 = vector.shape_cast %338 : vector<1x8x128xf32> to vector<8x128xf32>
    %340 = vector.shape_cast %337 : vector<8x128xf32> to vector<1x8x128xf32>
    tpu.vector_store %arg3[%c0_254, %c0_255, %c0_256], %340 {strides = array<i32>} : memref<1x8x128xf32, #tpu.memory_space<vmem>>, vector<1x8x128xf32>,
    return
  }
  func.func @transform_0(%arg0: i32) -> (i32, i32, i32, i32) {
    %c0_i32 = arith.constant 0 : i32
    %c0_i32_0 = arith.constant 0 : i32
    %c0_i32_1 = arith.constant 0 : i32
    %c0_i32_2 = arith.constant 0 : i32
    return %arg0, %c0_i32, %c0_i32_0, %c0_i32_1 : i32, i32, i32, i32
  }
  func.func @transform_1(%arg0: i32) -> (i32, i32, i32, i32) {
    %c0_i32 = arith.constant 0 : i32
    %c0_i32_0 = arith.constant 0 : i32
    %c0_i32_1 = arith.constant 0 : i32
    %c0_i32_2 = arith.constant 0 : i32
    return %arg0, %c0_i32, %c0_i32_0, %c0_i32_1 : i32, i32, i32, i32
  }
  func.func @transform_2(%arg0: i32) -> (i32, i32, i32) {
    %c0_i32 = arith.constant 0 : i32
    %c0_i32_0 = arith.constant 0 : i32
    %c0_i32_1 = arith.constant 0 : i32
    return %arg0, %c0_i32, %c0_i32_0 : i32, i32, i32
  }
}

</mosaic_0001>

<bundles_post_ra>
// kernel: yolo_loss.1
= control target key start
LH: loop header
LB: loop body
LE: loop exit
PB: predicated region body
PF: predicated region fallthrough
CT: control target
= control target key end

     0   :  { %s711_s0 = inlined_call_operand.vmem [shape: f32[1,30,8,128], index: 0, kind: input, shape index: {}]   ;;  %s712_s1 = inlined_call_operand.vmem [shape: f32[1,30,8,128], index: 1, kind: input, shape index: {}]   ;;  %s713_s2 = inlined_call_operand.vmem [shape: f32[1,8,128], index: 2, kind: output, shape index: {}]  }
   0x1   :  { %v330_v0 = vld [vmem:[%s711_s0 + $0x50] sm:$0xff]  ;;  %v332_v3 = vld [vmem:[%s711_s0 + $0x58] sm:$0xff]  ;;  %v334_v5 = vld [vmem:[%s711_s0 + $0x60] sm:$0xff] }
   0x2   :  { %v331_v1 = vld [vmem:[%s712_s1 + $0x50] sm:$0xff]  ;;  %v333_v4 = vld [vmem:[%s712_s1 + $0x58] sm:$0xff]  ;;  %v335_v7 = vld [vmem:[%s712_s1 + $0x60] sm:$0xff] }
   0x3   :  { %v31_v2 = vsub.f32 %v330_v0, %v331_v1  ;;  %v38_v6 = vsub.f32 %v332_v3, %v333_v4  ;;  %v336_v8 = vld [vmem:[%s711_s0 + $0x68] sm:$0xff]  ;;  %v45_v11 = vsub.f32 %v334_v5, %v335_v7  ;;  %v338_v15 = vld [vmem:[%s711_s0 + $0x70] sm:$0xff]  ;;  %v340_v21 = vld [vmem:[%s711_s0 + $0x78] sm:$0xff] }
   0x4   :  { %v337_v9 = vld [vmem:[%s712_s1 + $0x68] sm:$0xff]  ;;  %v339_v16 = vld [vmem:[%s712_s1 + $0x70] sm:$0xff]  ;;  %v341_v22 = vld [vmem:[%s712_s1 + $0x78] sm:$0xff] }
   0x5   :  { %v32_v10 = vmul.f32 %v31_v2, %v31_v2  ;;  %v39_v12 = vmul.f32 %v38_v6, %v38_v6  ;;  %v52_v13 = vsub.f32 %v336_v8, %v337_v9  ;;  %v46_v14 = vmul.f32 %v45_v11, %v45_v11  ;;  %v342_v23 = vld [vmem:[%s711_s0 + $0x80] sm:$0xff]  ;;  %v344_v28 = vld [vmem:[%s711_s0 + $0x88] sm:$0xff]  ;;  %v472_v33 = vld [vmem:[%s712_s1 + $0x10] sm:$0xff] }
   0x6   :  { %v59_v20 = vsub.f32 %v338_v15, %v339_v16  ;;  %v343_v24 = vld [vmem:[%s712_s1 + $0x80] sm:$0xff]  ;;  %v66_v27 = vsub.f32 %v340_v21, %v341_v22  ;;  %v345_v29 = vld [vmem:[%s712_s1 + $0x88] sm:$0xff]  ;;  %v477_v34 = vld [vmem:[%s712_s1 + $0x18] sm:$0xff]  ;;  %v177_v37 = vmul.f32 0.5, %v472_v33 }
   0x7   :  { %v40_v17 = vadd.f32 %v39_v12, %v32_v10  ;;  %v53_v19 = vmul.f32 %v52_v13, %v52_v13  ;;  %v462_v30 = vld [vmem:[%s712_s1] sm:$0xff]  ;;  %v73_v31 = vsub.f32 %v342_v23, %v343_v24  ;;  %v467_v32 = vld [vmem:[%s712_s1 + $0x8] sm:$0xff]  ;;  %v80_v36 = vsub.f32 %v344_v28, %v345_v29  ;;  %v495_v41 = vld [vmem:[%s711_s0 + $0x10] sm:$0xff] }
   0x8   :  { %v60_v26 = vmul.f32 %v59_v20, %v59_v20  ;;  %v176_v35 = vmul.f32 0.14285715, %v462_v30  ;;  %v179_v38 = vmul.f32 0.14285715, %v467_v32  ;;  %v485_v39 = vld [vmem:[%s711_s0] sm:$0xff]  ;;  %v490_v40 = vld [vmem:[%s711_s0 + $0x8] sm:$0xff]  ;;  %v67_v43 = vmul.f32 %v66_v27, %v66_v27 }
   0x9   :  { %v47_v18 = vadd.f32 %v46_v14, %v40_v17  ;;  %v180_v44 = vmul.f32 0.5, %v477_v34  ;;  %v501_v45 = vld [vmem:[%s711_s0 + $0x18] sm:$0xff]  ;;  %v506_v46 = vld [vmem:[%s711_s0 + $0x28] sm:$0xff]  ;;  %v202_v47 = vmul.f32 0.14285715, %v485_v39  ;;  %v203_v50 = vmul.f32 0.5, %v495_v41 }
   0xa   :  { %v178_v48 = vsub.f32 %v176_v35, %v177_v37  ;;  %v182_v49 = vadd.f32 %v177_v37, %v176_v35  ;;  %v205_v51 = vmul.f32 0.14285715, %v490_v40  ;;  %v74_v52 = vmul.f32 %v73_v31, %v73_v31  ;;  %v514_v55 = vld [vmem:[%s711_s0 + $0x38] sm:$0xff]  ;;  %v346_v57 = vld [vmem:[%s711_s0 + $0x90] sm:$0xff]  ;;  %v532_v4 = vld [vmem:[%s711_s0 + $0x40] sm:$0xff] }
   0xb   :  { %v54_v25 = vadd.f32 %v53_v19, %v47_v18  ;;  %v181_v53 = vsub.f32 %v179_v38, %v180_v44  ;;  %v183_v54 = vadd.f32 %v180_v44, %v179_v38  ;;  %v206_v56 = vmul.f32 0.5, %v501_v45  ;;  %v347_v58 = vld [vmem:[%s712_s1 + $0x90] sm:$0xff]  ;;  %v348_v22 = vld [vmem:[%s711_s0 + $0x98] sm:$0xff] }
   0xc   :  { %v184_v59 = vsub.f32 %v182_v49, %v178_v48  ;;  %v204_v60 = vsub.f32 %v202_v47, %v203_v50  ;;  %v208_v61 = vadd.f32 %v203_v50, %v202_v47  ;;  %v228_v62 = vmul.f32 0.14285715, %v506_v46  ;;  %v527_v1 = vld [vmem:[%s711_s0 + $0x30] sm:$0xff]  ;;  %v349_v23 = vld [vmem:[%s712_s1 + $0x98] sm:$0xff]  ;;  %v350_v50 = vld [vmem:[%s711_s0 + $0xa0] sm:$0xff] }
   0xd   :  { %v61_v42 = vadd.f32 %v60_v26, %v54_v25  ;;  %v185_v0 = vsub.f32 %v183_v54, %v181_v53  ;;  %v207_v2 = vsub.f32 %v205_v51, %v206_v56  ;;  %v209_v3 = vadd.f32 %v206_v56, %v205_v51 }
   0xe   :  { %v210_v5 = vmin.f32 %v208_v61, %v182_v49  ;;  %v211_v6 = vmax.f32 %v204_v60, %v178_v48  ;;  %v219_v7 = vsub.f32 %v208_v61, %v204_v60  ;;  %v229_v8 = vmul.f32 0.5, %v514_v55 }
   0xf   :  { %v68_v63 = vadd.f32 %v67_v43, %v61_v42  ;;  %v87_v9 = vsub.f32 %v346_v57, %v347_v58  ;;  %v186_v10 = vmul.f32 %v185_v0, %v184_v59  ;;  %v214_v11 = vmin.f32 %v209_v3, %v183_v54  ;;  %v353_v0 = vld [vmem:[%s712_s1 + $0xa8] sm:$0xff] }
  0x10   :  { %v215_v12 = vmax.f32 %v207_v2, %v181_v53  ;;  %v212_v13 = vsub.f32 %v210_v5, %v211_v6  ;;  %v220_v14 = vsub.f32 %v209_v3, %v207_v2  ;;  %v230_v15 = vsub.f32 %v228_v62, %v229_v8 }
  0x11   :  { %v231_v16 = vmul.f32 0.14285715, %v527_v1  ;;  %v81_v17 = vmul.f32 %v80_v36, %v80_v36  ;;  %v232_v19 = vmul.f32 0.5, %v532_v4  ;;  %v234_v20 = vadd.f32 %v229_v8, %v228_v62  ;;  %v354_v8 = vld [vmem:[%s711_s0 + $0xb0] sm:$0xff] }
  0x12   :  { %v216_v18 = vsub.f32 %v214_v11, %v215_v12  ;;  %v75_v21 = vadd.f32 %v74_v52, %v68_v63  ;;  %v213_v24 = vmax.f32 %v212_v13, 0.0  ;;  %v221_v25 = vmul.f32 %v220_v14, %v219_v7  ;;  %v352_v63 = vld [vmem:[%s711_s0 + $0xa8] sm:$0xff]  ;;  %v356_v14 = vld [vmem:[%s711_s0 + $0xb8] sm:$0xff] }
  0x13   :  { %v237_v26 = vmax.f32 %v230_v15, %v178_v48  ;;  %v233_v28 = vsub.f32 %v231_v16, %v232_v19  ;;  %v235_v29 = vadd.f32 %v232_v19, %v231_v16  ;;  %v236_v35 = vmin.f32 %v234_v20, %v182_v49  ;;  %v351_v48 = vld [vmem:[%s712_s1 + $0xa0] sm:$0xff] }
  0x14   :  { %v217_v27 = vmax.f32 %v216_v18, 0.0  ;;  %v222_v31 = vadd.f32 %v221_v25, %v186_v10  ;;  %v245_v36 = vsub.f32 %v234_v20, %v230_v15  ;;  %v94_v37 = vsub.f32 %v348_v22, %v349_v23  ;;  %v357_v15 = vld [vmem:[%s712_s1 + $0xb8] sm:$0xff]  ;;  %v358_v20 = vld [vmem:[%s711_s0 + $0xc0] sm:$0xff] }
  0x15   :  { %v240_v42 = vmin.f32 %v235_v29, %v183_v54  ;;  %v241_v43 = vmax.f32 %v233_v28, %v181_v53  ;;  %v82_v44 = vadd.f32 %v81_v17, %v75_v21  ;;  %v88_v47 = vmul.f32 %v87_v9, %v87_v9  ;;  %v355_v9 = vld [vmem:[%s712_s1 + $0xb0] sm:$0xff]  ;;  %v359_v21 = vld [vmem:[%s712_s1 + $0xc0] sm:$0xff] }
  0x16   :  { %v218_v38 = vmul.f32 %v217_v27, %v213_v24  ;;  %v238_v51 = vsub.f32 %v236_v35, %v237_v26  ;;  %v246_v52 = vsub.f32 %v235_v29, %v233_v28  ;;  %v101_v59 = vsub.f32 %v350_v50, %v351_v48  ;;  %v360_v27 = vld [vmem:[%s711_s0 + $0xc8] sm:$0xff] }
  0x17   :  { %v242_v57 = vsub.f32 %v240_v42, %v241_v43  ;;  %v89_v53 = vadd.f32 %v88_v47, %v82_v44  ;;  %v95_v60 = vmul.f32 %v94_v37, %v94_v37  ;;  %v108_v7 = vsub.f32 %v352_v63, %v353_v0  ;;  %v361_v28 = vld [vmem:[%s712_s1 + $0xc8] sm:$0xff]  ;;  %v362_v42 = vld [vmem:[%s711_s0 + $0xd0] sm:$0xff]  ;;  %v601_v44 = vld [vmem:[%s712_s1 + $0x20] sm:$0xff] }
  0x18   :  { %v223_v56 = vsub.f32 %v222_v31, %v218_v38  ;;  %v239_v49 = vmax.f32 %v238_v51, 0.0  ;;  %v247_v58 = vmul.f32 %v246_v52, %v245_v36  ;;  %v102_v6 = vmul.f32 %v101_v59, %v101_v59  ;;  %v363_v43 = vld [vmem:[%s712_s1 + $0xd0] sm:$0xff]  ;;  %v606_v47 = vld [vmem:[%s711_s0 + $0x20] sm:$0xff]  ;;  %v626_v52 = vld [vmem:[%s711_s0 + $0x48] sm:$0xff] }
  0x19   :  { %v243_v54 = vmax.f32 %v242_v57, 0.0  ;;  %v96_v5 = vadd.f32 %v95_v60, %v89_v53  ;;  %v109_v12 = vmul.f32 %v108_v7, %v108_v7  ;;  %v115_v13 = vsub.f32 %v354_v8, %v355_v9 }
  0x1a   :  { %vm224_vm0 = vcmp.eq.f32.partialorder %v223_v56, 0.0  ;;  %v248_v62 = vadd.f32 %v247_v58, %v186_v10  ;;  %v122_v18 = vsub.f32 %v356_v14, %v357_v15  ;;  %v129_v24 = vsub.f32 %v358_v20, %v359_v21  ;;  %v381_v58 = vld [vmem:[%s712_s1 + $0x30] sm:$0xff] }
  0x1b   :  { %v225_v61 = vsel %vm224_vm0, 1.0, %v223_v56  ;;  %v244_v2 = vmul.f32 %v243_v54, %v239_v49  ;;  %v103_v11 = vadd.f32 %v102_v6, %v96_v5  ;;  %v116_v17 = vmul.f32 %v115_v13, %v115_v13  ;;  %v380_v49 = vld [vmem:[%s712_s1 + $0x28] sm:$0xff] }
  0x1c   :  { %384 = vrcp.f32 %v225_v61  ;;  %v123_v23 = vmul.f32 %v122_v18, %v122_v18  ;;  %v130_v35 = vmul.f32 %v129_v24, %v129_v24  ;;  %v136_v36 = vsub.f32 %v360_v27, %v361_v28  ;;  %v368_v18 = vld [vmem:[%s711_s0 + $0xe8] sm:$0xff] }
  0x1d   :  { %v249_v3 = vsub.f32 %v248_v62, %v244_v2  ;;  %v110_v16 = vadd.f32 %v109_v12, %v103_v11  ;;  %v143_v57 = vsub.f32 %v362_v42, %v363_v43  ;;  %v16_v59 = vsub.f32 %v606_v47, %v601_v44 }
  0x1e   :  { %v137_v56 = vmul.f32 %v136_v36, %v136_v36  ;;  %vm22_vm11 = vcmp.eq.f32.partialorder %v601_v44, 0.0  ;;  %vm13_vm12 = vcmp.gt.f32.partialorder %v601_v44, 0.0 }
  0x1f   :  { %vm250_vm1 = vcmp.eq.f32.partialorder %v249_v3, 0.0  ;;  %v117_v22 = vadd.f32 %v116_v17, %v110_v16  ;;  %v144_v61 = vmul.f32 %v143_v57, %v143_v57 }
  0x20   :  { %v251_v10 = vsel %vm250_vm1, 1.0, %v249_v3  ;;  %v366_v3 = vld [vmem:[%s711_s0 + $0xe0] sm:$0xff] }
  0x21   :  { %386 = vrcp.f32 %v251_v10  ;;  %v124_v31 = vadd.f32 %v123_v23, %v117_v22 }
  0x26   :  { %v385_v19 = vpop.eup %384 }
  0x27   :  { %v573_v25 = vmul.f32 %v385_v19, %v218_v38  ;;  %v382_v38 = vld [vmem:[%s712_s1 + $0x38] sm:$0xff]  ;;  %v369_v19 = vld [vmem:[%s712_s1 + $0xe8] sm:$0xff] }
  0x2b   :  { %v387_v26 = vpop.eup %386 }
  0x2c   :  { %v581_v29 = vmul.f32 %v387_v26, %v244_v2 }
  0x2e   :  { %vm585_vm2 = vcmp.gt.f32.partialorder %v581_v29, %v573_v25 }
  0x2f   :  { %v270_v50 = vsel %vm585_vm2, %v514_v55, %v495_v41  ;;  %v615_v48 = vsel %vm585_vm2, %v382_v38, %v472_v33  ;;  %v621_v51 = vsel %vm585_vm2, %v532_v4, %v501_v45  ;;  %v329_v41 = vld [vmem:[%s712_s1 + $0x48] sm:$0xff]  ;;  %v131_v55 = vadd.f32 %v130_v35, %v124_v31  ;;  %v383_v33 = vld [vmem:[%s712_s1 + $0x40] sm:$0xff]  ;;  %v364_v45 = vld [vmem:[%s711_s0 + $0xd8] sm:$0xff] }
  0x30   :  { %388 = vrsqrt.f32 %v270_v50  ;;  %v365_v4 = vld [vmem:[%s712_s1 + $0xd8] sm:$0xff]  ;;  %v21_v54 = vsub.f32 %v626_v52, %v329_v41  ;;  %v299_v53 = vsel %vm585_vm2, %v383_v33, %v477_v34  ;;  %v260_v63 = vsel %vm585_vm2, %v506_v46, %v485_v39  ;;  %v367_v39 = vld [vmem:[%s712_s1 + $0xe0] sm:$0xff] }
  0x31   :  { %390 = vrsqrt.f32 %v615_v48  ;;  %v138_v60 = vadd.f32 %v137_v56, %v131_v55  ;;  %v150_v62 = vsub.f32 %v364_v45, %v365_v4  ;;  %v263_v0 = vsel %vm585_vm2, %v380_v49, %v462_v30 }
  0x32   :  { %392 = vrsqrt.f32 %v621_v51  ;;  %v265_v2 = vsel %vm585_vm2, %v527_v1, %v490_v40  ;;  %v268_v34 = vsel %vm585_vm2, %v381_v58, %v467_v32  ;;  %v23_v46 = vmul.f32 %v16_v59, %v16_v59 }
  0x33   :  { %394 = vrsqrt.f32 %v299_v53  ;;  %v24_v5 = vmul.f32 %v21_v54, %v21_v54  ;;  %v264_v30 = vsub.f32 %v260_v63, %v263_v0  ;;  %v269_v6 = vsub.f32 %v265_v2, %v268_v34 }
  0x34   :  { %v145_v7 = vadd.f32 %v144_v61, %v138_v60  ;;  %v151_v8 = vmul.f32 %v150_v62, %v150_v62  ;;  %v157_v9 = vsub.f32 %v366_v3, %v367_v39  ;;  %v255_v32 = vsel %vm585_vm2, %v581_v29, %v573_v25 }
  0x35   :  { %vm273_vm3 = vcmp.eq.f32.partialorder %v270_v50, inf  ;;  %vm275_vm4 = vcmp.eq.f32.partialorder %v270_v50, 0.0  ;;  %v276_v1 = vand.u32 2147483648, %v270_v50  ;;  %vm283_vm5 = vcmp.eq.f32.partialorder %v615_v48, inf }
  0x36   :  { %vm285_vm6 = vcmp.eq.f32.partialorder %v615_v48, 0.0  ;;  %v286_v12 = vand.u32 2147483648, %v615_v48  ;;  %vm292_vm7 = vcmp.eq.f32.partialorder %v621_v51, inf  ;;  %v295_v15 = vand.u32 2147483648, %v621_v51 }
  0x37   :  { %v308_v16 = vmul.f32 %v264_v30, %v264_v30  ;;  %v309_v17 = vmul.f32 %v269_v6, %v269_v6  ;;  %v256_v20 = vsel %vm585_vm2, %v626_v52, %v606_v47  ;;  %vm294_vm8 = vcmp.eq.f32.partialorder %v621_v51, 0.0 }
  0x38   :  { %vm302_vm9 = vcmp.eq.f32.partialorder %v299_v53, inf  ;;  %v305_v26 = vand.u32 2147483648, %v299_v53  ;;  %vm304_vm10 = vcmp.eq.f32.partialorder %v299_v53, 0.0  ;;  %v164_v31 = vsub.f32 %v368_v18, %v369_v19 }
  0x39   :  { %v310_v37 = vadd.f32 %v309_v17, %v308_v16  ;;  %v152_v38 = vadd.f32 %v151_v8, %v145_v7  ;;  %v158_v42 = vmul.f32 %v157_v9, %v157_v9  ;;  %v257_v43 = vsub.f32 %v256_v20, %v255_v32 }
  0x3a   :  { %v389_v40 = vpop.eup %388  ;;  %v25_v41 = vadd.f32 %v24_v5, %v23_v46  ;;  %v165_v57 = vmul.f32 %v164_v31, %v164_v31 }
  0x3b   :  { %v391_v10 = vpop.eup %390  ;;  %v272_v11 = vmul.f32 %v389_v40, %v270_v50  ;;  %v159_v56 = vadd.f32 %v158_v42, %v152_v38 }
  0x3c   :  { %v393_v13 = vpop.eup %392  ;;  %v282_v14 = vmul.f32 %v391_v10, %v615_v48  ;;  %v26_v45 = vsel %vm22_vm11, %v25_v41, 0.0 }
  0x3d   :  { %v274_v21 = vsel %vm273_vm3, %v270_v50, %v272_v11  ;;  %v291_v22 = vmul.f32 %v393_v13, %v621_v51  ;;  %v395_v23 = vpop.eup %394  ;;  %v166_v49 = vadd.f32 %v165_v57, %v159_v56 }
  0x3e   :  { %v277_v24 = vsel %vm275_vm4, %v276_v1, %v274_v21  ;;  %v284_v25 = vsel %vm283_vm5, %v615_v48, %v282_v14  ;;  %v301_v29 = vmul.f32 %v395_v23, %v299_v53 }
  0x3f   :  { %v287_v27 = vsel %vm285_vm6, %v286_v12, %v284_v25  ;;  %v293_v28 = vsel %vm292_vm7, %v621_v51, %v291_v22  ;;  %v258_v51 = vmul.f32 %v257_v43, %v257_v43  ;;  %v167_v61 = vsel %vm13_vm12, %v166_v49, 0.0 }
  0x40   :  { %v288_v35 = vsub.f32 %v277_v24, %v287_v27  ;;  %v296_v36 = vsel %vm294_vm8, %v295_v15, %v293_v28  ;;  %v303_v47 = vsel %vm302_vm9, %v299_v53, %v301_v29  ;;  %v318_v53 = vmul.f32 0.5, %v26_v45 }
  0x41   :  { %v306_v50 = vsel %vm304_vm10, %v305_v26, %v303_v47  ;;  %v259_v58 = vsel %vm13_vm12, %v258_v51, 0.0 }
  0x42   :  { %v311_v52 = vmul.f32 %v288_v35, %v288_v35  ;;  %v307_v55 = vsub.f32 %v296_v36, %v306_v50 }
  0x44   :  { %v312_v48 = vadd.f32 %v311_v52, %v310_v37  ;;  %v313_v33 = vmul.f32 %v307_v55, %v307_v55 }
  0x46   :  { %v314_v4 = vadd.f32 %v313_v33, %v312_v48 }
  0x48   :  { %v315_v59 = vsel %vm13_vm12, %v314_v4, 0.0 }
  0x49   :  { %v316_v54 = vmul.f32 5.0, %v315_v59 }
  0x4b   :  { %v317_v60 = vadd.f32 %v316_v54, %v259_v58 }
  0x4d   :  { %v319_v62 = vadd.f32 %v318_v53, %v317_v60 }
  0x4f   :  { %v320_v63 = vadd.f32 %v319_v62, %v167_v61 }
  0x51   :  { %321 = vst [vmem:[%s713_s2] sm:$0xff] %v320_v63 }

</bundles_post_ra>
